<compile_context>
chip_gen: v7x
topology: tpu7x:2x2x1
jax: 0.10.0
libtpu: 0.0.40
codegen_flags: <defaults>
</compile_context>

<pallas_src>
import functools
import math

import jax
import jax.numpy as jnp
from jax.experimental import pallas as pl
from jax.experimental.pallas import tpu as pltpu


def gated_attention_kernel(x_ref, wvu_ref, bvu_ref, ww_ref, o_ref, *, n_inst):
    # x_ref:   (TB*N, F)          pre-flattened LHS (TB bags per grid step)
    # wvu_ref: (F, 2H)            [wv | wu] fused
    # bvu_ref: (1, 2H)  f32       [bv | bu] fused
    # ww_ref:  (1, H)   f32       scoring weight as a lane-major row
    # o_ref:   (1, 8, TB*N//8)    lane-dense per-step score block
    rows, _ = x_ref.shape
    H = ww_ref.shape[1]
    tb = rows // n_inst

    # One fused MXU matmul for the V and U branches (f32 accumulation), then
    # f32 bias / nonlinearities (no bf16 VPU/EUP on v5e).
    pre = jnp.dot(x_ref[...], wvu_ref[...], preferred_element_type=jnp.float32)
    pre = pre + bvu_ref[...]                                     # (rows, 2H) f32
    a_v = jnp.tanh(pre[:, :H])                                   # (rows, H)
    a_u = jax.nn.sigmoid(pre[:, H:])                             # (rows, H)
    gated = a_v * a_u                                            # (rows, H)

    # Score: VPU broadcast-multiply + lane (XLU) reduce -> (tb, N).  bw is
    # omitted: softmax over N is shift-invariant, so a scalar bias is a no-op.
    g3 = gated.reshape(tb, n_inst, H)
    s = jnp.sum(g3 * ww_ref[...].reshape(1, 1, H), axis=-1)      # (tb, N)

    # Softmax over instances, lane-major (N on the lane axis).
    s = s - jnp.max(s, axis=-1, keepdims=True)
    e = jnp.exp(s)
    denom = jnp.sum(e, axis=-1, keepdims=True)                   # (tb, 1)
    r = pl.reciprocal(denom, approx=True)                        # EUP vrcp (free slot)
    r = r * (2.0 - denom * r)                                    # Newton step -> ~f32 exact
    p = e * r                                                    # (tb, N)

    # Single relayout folded into the lane-dense output store.
    o_ref[...] = p.reshape(o_ref.shape)


def gated_attention(x, wv, bv, wu, bu, ww, bw=None, *, tb=None, matmul_dtype=None):
    """x: (B, N, F); returns softmax attention weights of shape (B, 1, N)."""
    B, N, F = x.shape
    H = wv.shape[1]
    assert wu.shape == (F, H) and ww.shape == (H, 1)
    del bw  # softmax over N is shift-invariant -> the scalar bias is a no-op.

    # Fuse the V / U branches into one weight / bias (one-time, wrapper side).
    w_vu = jnp.concatenate([wv, wu], axis=1)                                # (F, 2H)
    b_vu = jnp.concatenate([bv.reshape(1, H), bu.reshape(1, H)], axis=1)    # (1, 2H)
    b_vu = b_vu.astype(jnp.float32)
    ww_row = ww.reshape(1, H).astype(jnp.float32)                           # (1, H)

    if matmul_dtype is not None:
        # Halves HBM traffic for the read-bound x stream and hits the native
        # bf16 MXU rate; accumulation / bias / nonlinearities stay f32.
        x = x.astype(matmul_dtype)
        w_vu = w_vu.astype(matmul_dtype)

    # ---- Generation-aware VMEM budget -------------------------------------
    try:
        vmem_cap = getattr(pltpu.get_tpu_info(), "vmem_capacity_bytes", 64 << 20)
    except Exception:  # e.g. interpret mode / no TPU info available
        vmem_cap = 64 << 20
    # ~96 MiB on the 128-MiB chips (v5e/v6e), ~48 MiB on v7x's 64 MiB.
    vmem_limit = int(min(0.75 * vmem_cap, float(96 << 20)))
    budget = max(1 << 20, vmem_limit // 2)   # headroom for weights + scratch

    itemsize = jnp.dtype(x.dtype).itemsize
    LANE = 128
    f_lanes = pl.cdiv(F, LANE) * LANE        # VMEM lane padding of the F axis
    # Per (bag,instance) row: double-buffered x block (lane padded) + f32
    # intermediates (pre: 2H, a_v/a_u/gated: 3H) + output.
    per_row = 2 * f_lanes * itemsize + (2 * H + 3 * H) * 4 + 2 * 4

    # ---- Pick the number of bags per grid step ----------------------------
    if tb is None:
        target_rows = 4096                                  # ~2K-8K MXU rows/step
        tb = max(1, target_rows // N)
        tb = min(tb, max(1, budget // (per_row * N)))       # stay inside VMEM
        tb = min(tb, B)                                     # bound batch padding
        # Keep >=2 grid steps for v7x's two TensorCores when the split does
        # not push the step back into overhead-bound territory.
        if tb >= B and B >= 2 and (B // 2) * N >= 512:
            tb = pl.cdiv(B, 2)
    # tb*N must be a multiple of 8 (x-block sublane dim + dense output layout).
    m = 8 // math.gcd(N, 8)
    tb = max(m, (tb // m) * m)

    G = pl.cdiv(B, tb)
    B_pad = G * tb
    if B_pad != B:
        x = jnp.pad(x, ((0, B_pad - B), (0, 0), (0, 0)))

    # Pre-flatten: 2D MXU LHS, no in-kernel repack.
    x2 = x.reshape(B_pad * N, F)
    rows = tb * N

    out = pl.pallas_call(
        functools.partial(gated_attention_kernel, n_inst=N),
        out_shape=jax.ShapeDtypeStruct((G, 8, rows // 8), jnp.float32),
        grid=(G,),
        in_specs=[
            pl.BlockSpec((rows, F), lambda b: (b, 0)),
            pl.BlockSpec((F, 2 * H), lambda b: (0, 0)),
            pl.BlockSpec((1, 2 * H), lambda b: (0, 0)),
            pl.BlockSpec((1, H), lambda b: (0, 0)),
        ],
        out_specs=pl.BlockSpec((1, 8, rows // 8), lambda b: (b, 0, 0)),
        compiler_params=pltpu.CompilerParams(
            dimension_semantics=("parallel",),
            vmem_limit_bytes=vmem_limit,
        ),
    )(x2, w_vu, b_vu, ww_row)

    # (G, 8, rows//8) flattens row-major to bag-major scores.
    out = out.reshape(B_pad, N)[:B]
    return out[:, None, :]


def reference(x, wv, bv, wu, bu, ww, bw):
    a_v = jnp.tanh(x @ wv + bv)
    a_u = jax.nn.sigmoid(x @ wu + bu)
    a = (a_v * a_u) @ ww + bw                 # (B, N, 1)
    a = jnp.transpose(a, (0, 2, 1))           # (B, 1, N)
    return jax.nn.softmax(a, axis=2)


if __name__ == "__main__":
    B, N, F_IN, H = 2, 8, 32, 128  # H fixed to 128 by the module

    key = jax.random.PRNGKey(0)
    kx, kv, kbv, ku, kbu, kw, kbw = jax.random.split(key, 7)

    x = jax.random.normal(kx, (B, N, F_IN), dtype=jnp.float32)

    # Deterministic parameter init (PyTorch Linear weights are (out, in);
    # stored transposed as (in, out) for x @ W).
    bound_v = 1.0 / jnp.sqrt(F_IN)
    wv = jax.random.uniform(kv, (F_IN, H), minval=-bound_v, maxval=bound_v, dtype=jnp.float32)
    bv = jax.random.uniform(kbv, (1, H), minval=-bound_v, maxval=bound_v, dtype=jnp.float32)
    wu = jax.random.uniform(ku, (F_IN, H), minval=-bound_v, maxval=bound_v, dtype=jnp.float32)
    bu = jax.random.uniform(kbu, (1, H), minval=-bound_v, maxval=bound_v, dtype=jnp.float32)
    bound_w = 1.0 / jnp.sqrt(H)
    ww = jax.random.uniform(kw, (H, 1), minval=-bound_w, maxval=bound_w, dtype=jnp.float32)
    bw = jax.random.uniform(kbw, (1, 1), minval=-bound_w, maxval=bound_w, dtype=jnp.float32)

    ref = reference(x, wv, bv, wu, bu, ww, bw)

    # 1) Default (f32-exact) path.
    out = jax.block_until_ready(gated_attention(x, wv, bv, wu, bu, ww, bw))
    assert out.shape == (B, 1, N)
    assert jnp.allclose(out, ref, atol=1e-5, rtol=1e-5)

    # 2) Multi-step grid + batch-padding path (B not a multiple of tb).
    B2 = 3
    x2 = jax.random.normal(jax.random.PRNGKey(1), (B2, N, F_IN), dtype=jnp.float32)
    out2 = jax.block_until_ready(gated_attention(x2, wv, bv, wu, bu, ww, bw, tb=2))
    ref2 = reference(x2, wv, bv, wu, bu, ww, bw)
    assert out2.shape == (B2, 1, N)
    assert jnp.allclose(out2, ref2, atol=1e-5, rtol=1e-5)

    # 3) bf16 matmul path (perf-review item): relaxed tolerance vs f32 ref.
    out3 = jax.block_until_ready(
        gated_attention(x, wv, bv, wu, bu, ww, bw, matmul_dtype=jnp.bfloat16))
    assert out3.shape == (B, 1, N)
    assert jnp.allclose(out3, ref, atol=1e-2, rtol=1e-2)

    print("KERNEL_OK")
</pallas_src>

<mosaic_0001>
module attributes {stable_mosaic.version = 11 : i64} {
  func.func @gated_attention_kernel(%arg0: i32, %arg1: memref<16x32xf32, #tpu.memory_space<vmem>>, %arg2: memref<32x256xf32, #tpu.memory_space<vmem>>, %arg3: memref<1x256xf32, #tpu.memory_space<vmem>>, %arg4: memref<1x128xf32, #tpu.memory_space<vmem>>, %arg5: memref<1x8x2xf32, #tpu.memory_space<vmem>>) attributes {dimension_semantics = [#tpu.dimension_semantics<parallel>], iteration_bounds = array<i64: 1>, scalar_prefetch = 0 : i64, scratch_operands = 0 : i64, tpu.core_type = #tpu.core_type<tc>, window_params = [{transform_indices = @transform_0, window_bounds = array<i64: 16, 32>}, {pipeline_mode = #tpu.pipeline_mode<synchronous>, transform_indices = @transform_1, window_bounds = array<i64: 32, 256>}, {pipeline_mode = #tpu.pipeline_mode<synchronous>, transform_indices = @transform_2, window_bounds = array<i64: 1, 256>}, {pipeline_mode = #tpu.pipeline_mode<synchronous>, transform_indices = @transform_3, window_bounds = array<i64: 1, 128>}, {transform_indices = @transform_4, window_bounds = array<i64: 1, 8, 2>}]} {
    %c0 = arith.constant 0 : index
    %c0_0 = arith.constant 0 : index
    %0 = vector.load %arg1[%c0, %c0_0] : memref<16x32xf32, #tpu.memory_space<vmem>>, vector<16x32xf32>
    %c0_1 = arith.constant 0 : index
    %c0_2 = arith.constant 0 : index
    %1 = vector.load %arg2[%c0_1, %c0_2] : memref<32x256xf32, #tpu.memory_space<vmem>>, vector<32x256xf32>
    %cst = arith.constant dense<0.000000e+00> : vector<16x256xf32>
    %2 = tpu.matmul %0, %1, %cst {dimension_numbers = #tpu.dot_dimension_numbers<[1], [0], [0], [1], [0, 0, 1, 1], [], []>} : vector<16x32xf32>, vector<32x256xf32>, vector<16x256xf32> -> vector<16x256xf32>
    %c0_3 = arith.constant 0 : index
    %c0_4 = arith.constant 0 : index
    %3 = vector.load %arg3[%c0_3, %c0_4] : memref<1x256xf32, #tpu.memory_space<vmem>>, vector<1x256xf32>
    %4 = vector.broadcast %3 : vector<1x256xf32> to vector<16x256xf32>
    %5 = arith.addf %2, %4 : vector<16x256xf32>
    %6 = vector.extract_strided_slice %5 {offsets = [0, 0], sizes = [16, 128], strides = [1, 1]} : vector<16x256xf32> to vector<16x128xf32>
    %7 = math.tanh %6 : vector<16x128xf32>
    %8 = vector.extract_strided_slice %5 {offsets = [0, 128], sizes = [16, 128], strides = [1, 1]} : vector<16x256xf32> to vector<16x128xf32>
    %9 = arith.negf %8 : vector<16x128xf32>
    %10 = math.exp %9 : vector<16x128xf32>
    %cst_5 = arith.constant 1.000000e+00 : f32
    %11 = vector.broadcast %cst_5 : f32 to vector<16x128xf32>
    %12 = arith.addf %11, %10 : vector<16x128xf32>
    %13 = arith.divf %11, %12 : vector<16x128xf32>
    %14 = arith.mulf %7, %13 : vector<16x128xf32>
    %15 = vector.shape_cast %14 : vector<16x128xf32> to vector<2x8x128xf32>
    %c0_6 = arith.constant 0 : index
    %c0_7 = arith.constant 0 : index
    %16 = vector.load %arg4[%c0_6, %c0_7] : memref<1x128xf32, #tpu.memory_space<vmem>>, vector<1x128xf32>
    %17 = vector.shape_cast %16 : vector<1x128xf32> to vector<1x1x128xf32>
    %18 = vector.broadcast %17 : vector<1x1x128xf32> to vector<2x8x128xf32>
    %19 = arith.mulf %15, %18 : vector<2x8x128xf32>
    %cst_8 = arith.constant dense<0.000000e+00> : vector<2x8xf32>
    %20 = vector.multi_reduction <add>, %19, %cst_8 [2] : vector<2x8x128xf32> to vector<2x8xf32>
    %cst_9 = arith.constant dense<0xFF800000> : vector<2xf32>
    %21 = vector.multi_reduction <maximumf>, %20, %cst_9 [1] : vector<2x8xf32> to vector<2xf32>
    %22 = vector.shape_cast %21 : vector<2xf32> to vector<2x1xf32>
    %23 = vector.broadcast %22 : vector<2x1xf32> to vector<2x8xf32>
    %24 = arith.subf %20, %23 : vector<2x8xf32>
    %25 = math.exp %24 : vector<2x8xf32>
    %cst_10 = arith.constant dense<0.000000e+00> : vector<2xf32>
    %26 = vector.multi_reduction <add>, %25, %cst_10 [1] : vector<2x8xf32> to vector<2xf32>
    %27 = vector.shape_cast %26 : vector<2xf32> to vector<2x1xf32>
    %28 = tpu.reciprocal %27 {approx = true} : vector<2x1xf32> -> vector<2x1xf32>
    %29 = arith.mulf %27, %28 : vector<2x1xf32>
    %cst_11 = arith.constant 2.000000e+00 : f32
    %30 = vector.broadcast %cst_11 : f32 to vector<2x1xf32>
    %31 = arith.subf %30, %29 : vector<2x1xf32>
    %32 = arith.mulf %28, %31 : vector<2x1xf32>
    %33 = vector.broadcast %32 : vector<2x1xf32> to vector<2x8xf32>
    %34 = arith.mulf %25, %33 : vector<2x8xf32>
    %35 = vector.shape_cast %34 : vector<2x8xf32> to vector<1x8x2xf32>
    %c0_12 = arith.constant 0 : index
    %c0_13 = arith.constant 0 : index
    %c0_14 = arith.constant 0 : index
    %36 = vector.load %arg5[%c0_12, %c0_13, %c0_14] : memref<1x8x2xf32, #tpu.memory_space<vmem>>, vector<1x8x2xf32>
    tpu.vector_store %arg5[%c0_12, %c0_13, %c0_14], %35 {strides = array<i32>} : memref<1x8x2xf32, #tpu.memory_space<vmem>>, vector<1x8x2xf32>,
    return
  }
  func.func @transform_0(%arg0: i32) -> (i32, i32) {
    %c0_i32 = arith.constant 0 : i32
    %c0_i32_0 = arith.constant 0 : i32
    return %arg0, %c0_i32 : i32, i32
  }
  func.func @transform_1(%arg0: i32) -> (i32, i32) {
    %c0_i32 = arith.constant 0 : i32
    %c0_i32_0 = arith.constant 0 : i32
    %c0_i32_1 = arith.constant 0 : i32
    return %c0_i32, %c0_i32_0 : i32, i32
  }
  func.func @transform_2(%arg0: i32) -> (i32, i32) {
    %c0_i32 = arith.constant 0 : i32
    %c0_i32_0 = arith.constant 0 : i32
    %c0_i32_1 = arith.constant 0 : i32
    return %c0_i32, %c0_i32_0 : i32, i32
  }
  func.func @transform_3(%arg0: i32) -> (i32, i32) {
    %c0_i32 = arith.constant 0 : i32
    %c0_i32_0 = arith.constant 0 : i32
    %c0_i32_1 = arith.constant 0 : i32
    return %c0_i32, %c0_i32_0 : i32, i32
  }
  func.func @transform_4(%arg0: i32) -> (i32, i32, i32) {
    %c0_i32 = arith.constant 0 : i32
    %c0_i32_0 = arith.constant 0 : i32
    %c0_i32_1 = arith.constant 0 : i32
    return %arg0, %c0_i32, %c0_i32_0 : i32, i32, i32
  }
}

</mosaic_0001>

<bundles_post_ra>
// kernel: tpu_custom_call.1
= control target key start
LH: loop header
LB: loop body
LE: loop exit
PB: predicated region body
PF: predicated region fallthrough
CT: control target
= control target key end

     0   :  { %9 = vsyncpa [#allocation3], 0  ;;  %s620_s0 = inlined_call_operand.hbm [shape: f32[16,32], index: 0, kind: input, shape index: {}]   ;;  %s621_s1 = inlined_call_operand.hbm [shape: f32[32,256], index: 1, kind: input, shape index: {}]   ;;  %s622_s2 = inlined_call_operand.vmem [shape: f32[1,256], index: 2, kind: input, shape index: {}]   ;;  %s623_s3 = inlined_call_operand.vmem [shape: f32[1,128], index: 3, kind: input, shape index: {}]   ;;  %s624_s4 = inlined_call_operand.vmem [shape: f32[1,8,2], index: 4, kind: output, shape index: {}]  }
   0x1   :  { %10 = vsyncpa [#allocation5], 0  ;;  %s518_s15 = smov [#allocation2]   ;;  %s470_s19 = scalar_lea.hbm %s620_s0, 256 }
   0x2   :  { %s16_s16 = sshll.u32 %s518_s15, 4  ;;  %p471_p0 = scmp.ne.s32.totalorder %s620_s0, %s470_s19  ;;  %s17_s16 = int_to_ptr.vmem [resolvable:$true] %s16_s16 }
   0x3   :  { %p474_p1 = scmp.lt.u32.totalorder %s470_s19, %s620_s0 }
   0x5   :  { %p476_p2 = pnand %p474_p1, %p471_p0 }
   0x7   :  { %479 = shalt.err (!%p476_p2)
}
   0x8   :  { %s480_s24 = scalar_lea.vmem %s17_s16, 256  ;;  %p485_p4 = scmp.lt.s32.totalorder %s17_s16, %s17_s16 }
   0x9   :  { %p481_p3 = scmp.ne.s32.totalorder %s17_s16, %s480_s24  ;;  %p486_p5 = scmp.lt.s32.totalorder %s480_s24, %s480_s24 }
   0xb   :  { %p487_p6 = por %p486_p5, %p485_p4 }
   0xd   :  { %p488_p7 = pnand %p487_p6, %p481_p3 }
   0xf   :  { %491 = shalt.err (!%p488_p7)
}
  0x10   :  { %s519_s25 = smov 128   ;;  %s520_s26 = smov 8  }
  0x11   :  { %22 = dma.hbm_to_vmem [thread:$0]  %s620_s0, 256, %s17_s16, [#allocation3], %s519_s25, %s519_s25, %s520_s26  }
  0x12   :  { %s521_s29 = smov [#allocation4]   ;;  %s492_s7 = scalar_lea.hbm %s621_s1, 1024 }
  0x13   :  { %s28_s30 = sshll.u32 %s521_s29, 4  ;;  %p493_p8 = scmp.ne.s32.totalorder %s621_s1, %s492_s7  ;;  %s29_s30 = int_to_ptr.vmem [resolvable:$true] %s28_s30 }
  0x14   :  { %p496_p9 = scmp.lt.u32.totalorder %s492_s7, %s621_s1 }
  0x16   :  { %p498_p10 = pnand %p496_p9, %p493_p8 }
  0x18   :  { %501 = shalt.err (!%p498_p10)
}
  0x19   :  { %s502_s12 = scalar_lea.vmem %s29_s30, 1024  ;;  %p507_p12 = scmp.lt.s32.totalorder %s29_s30, %s29_s30 }
  0x1a   :  { %p503_p11 = scmp.ne.s32.totalorder %s29_s30, %s502_s12  ;;  %p508_p13 = scmp.lt.s32.totalorder %s502_s12, %s502_s12 }
  0x1c   :  { %p509_p0 = por %p508_p13, %p507_p12 }
  0x1e   :  { %p510_p1 = pnand %p509_p0, %p503_p11 }
  0x20   :  { %513 = shalt.err (!%p510_p1)
}
  0x21   :  { %s522_s0 = smov 256   ;;  %s523_s13 = smov 16  }
  0x22   :  { %34 = dma.hbm_to_vmem [thread:$0]  %s621_s1, 1024, %s29_s30, [#allocation5], %s522_s0, %s522_s0, %s523_s13  }
  0x23   :  { %514 = dma.done.wait [#allocation3], 256  }
  0x24   :  { %515 = vsyncadd [#allocation3], 4294967040 }
  0x25   :  { %516 = dma.done.wait [#allocation5], 1024  }
  0x26   :  { %517 = vsyncadd [#allocation5], 4294966272  ;;  %v524_v0 = vmov 0.0   ;;  %v48_v1 = vld [vmem:[#allocation4 + $0x8] sm:$0xff]  ;;  %v50_v2 = vld [vmem:[#allocation4 + $0x18] sm:$0xff]  ;;  %vm67_vm0 = vcmask 261120   ;;  %v57_v15 = vlaneseq }
  0x27   :  { %138 = vmatprep.mubr.f32.mxu0 %v524_v0  ;;  %144 = vmatprep.mubr.f32.mxu1 %v524_v0  ;;  %v47_v3 = vld [vmem:[#allocation4] sm:$0xff]  ;;  %v429_v4 = vpack.c.bf16 %v50_v2, %v48_v1  ;;  %v49_v5 = vld [vmem:[#allocation4 + $0x10] sm:$0xff]  ;;  %v52_v6 = vld [vmem:[#allocation4 + $0x28] sm:$0xff]  ;;  %vm192_vm1 = vcmask 1041409   ;;  %vm195_vm2 = vcmask 58368   ;;  %v525_v53 = vmov 0  }
  0x28   :  { %v54_v7 = vld [vmem:[#allocation4 + $0x38] sm:$0xff]  ;;  %v431_v8 = vpack.c.bf16 %v49_v5, %v47_v3  ;;  %v51_v10 = vld [vmem:[#allocation4 + $0x20] sm:$0xff]  ;;  %v53_v11 = vld [vmem:[#allocation4 + $0x30] sm:$0xff]  ;;  %v576_v16 = vshrl.u32 %v57_v15, 7  ;;  %v183_v45 = vand.u32 127, %v57_v15  ;;  %451 = vset.pattern.permute.xlu0 %v525_v53  ;;  %450 = vset.pattern.permute.xlu1 %v525_v53  ;;  %vm403_vm3 = vcmask 1042434  }
  0x29   :  { %v433_v9 = vpack.c.bf16 %v54_v7, %v52_v6  ;;  %430 = vmatprep.subr.bf16.mxu0 %v429_v4  ;;  %437 = vmatprep.subr.bf16.mxu1 %v429_v4  ;;  %v435_v12 = vpack.c.bf16 %v53_v11, %v51_v10  ;;  %v45_v13 = vld [vmem:[#allocation2] sm:$0xff]  ;;  %v46_v14 = vld [vmem:[#allocation2 + $0x8] sm:$0xff]  ;;  %v55_v18 = vld [vmem:[%s622_s2] sm:$0x3]  ;;  %v526_v6 = vmov 1983009808  }
  0x2a   :  { %432 = vmatpush1.bf16.msra.mxu0 %v431_v8  ;;  %439 = vmatpush1.bf16.msra.mxu1 %v431_v8  ;;  %v579_v17 = vsub.s32 1, %v576_v16  ;;  %v586_v28 = vsub.s32 0, %v576_v16  ;;  %v428_v39 = vld [vmem:[%s623_s3] ss:$0 sm:$0xff]  ;;  %v593_v47 = vsub.s32 %v183_v45, %v576_v16  ;;  %v258_v7 = vunpack.c.l.s4 %v526_v6 }
  0x2b   :  { %434 = vmatprep.subr.bf16.mxu0 %v433_v9  ;;  %438 = vmatprep.subr.bf16.mxu1 %v433_v9  ;;  %vm405_vm4 = vcmask 1043459   ;;  %vm407_vm5 = vcmask 1044484   ;;  %vm409_vm6 = vcmask 1045509   ;;  %vm411_vm7 = vcmask 1046534  }
  0x2c   :  { %v64_v19 = vrot.slane %v55_v18, %v579_v17  ;;  %v60_v29 = vrot.slane %v55_v18, %v586_v28  ;;  %v259_v10 = vunpack.c.0.s8 %v258_v7  ;;  %vm413_vm8 = vcmask 1047559  }
  0x2d   :  { %vm416_vm9 = vcmask 15360  }
  0x2e   :  { %436 = vmatpush1.bf16.msra.mxu0 %v435_v12  ;;  %440 = vmatpush1.bf16.msra.mxu1 %v435_v12 }
  0x31   :  { %424 = vmatmul.mubr.msk.f32.vlgmr.msra.gmra.mrb[0].mxu0 %vm67_vm0, %v45_v13  ;;  %425 = vmatmul.mubr.msk.f32.vlgmr.msra.gmra.mrb[0].mxu1 %vm67_vm0, %v46_v14  ;;  %v262_v13 = vsub.s32 %v259_v10, %v576_v16 }
 0x104   :  { %v140_v20 = vpop.f32.mrb[0].mxu0  ;;  %v146_v21 = vpop.f32.mrb[0].mxu1 }
 0x105   :  { %v142_v22 = vpop.f32.mrb[1].mxu0  ;;  %v148_v23 = vpop.f32.mrb[1].mxu1  ;;  %v141_v30 = vadd.f32 %v140_v20, %v60_v29  ;;  %v147_v31 = vadd.f32 %v146_v21, %v60_v29 }
 0x106   :  { %v143_v24 = vadd.f32 %v142_v22, %v64_v19  ;;  %v149_v25 = vadd.f32 %v148_v23, %v64_v19 }
 0x108   :  { %v426_v26 = vmul.f32 -1.442695, %v143_v24  ;;  %v427_v27 = vmul.f32 -1.442695, %v149_v25 }
 0x10a   :  { %452 = vpow2.f32 %v426_v26 }
 0x10b   :  { %454 = vpow2.f32 %v427_v27 }
 0x10c   :  { %456 = vtanh.f32 %v141_v30 }
 0x10d   :  { %458 = vtanh.f32 %v147_v31 }
 0x114   :  { %v453_v32 = vpop.eup %452 }
 0x115   :  { %v455_v33 = vpop.eup %454  ;;  %v159_v34 = vadd.f32 1.0, %v453_v32 }
 0x116   :  { %v160_v35 = vadd.f32 1.0, %v455_v33  ;;  %v457_v36 = vpop.eup %456 }
 0x117   :  { %460 = vrcp.f32 %v159_v34  ;;  %v459_v37 = vpop.eup %458 }
 0x118   :  { %462 = vrcp.f32 %v160_v35 }
 0x121   :  { %v461_v38 = vpop.eup %460 }
 0x122   :  { %v463_v40 = vpop.eup %462  ;;  %v165_v41 = vmul.f32 %v461_v38, %v457_v36 }
 0x123   :  { %v166_v42 = vmul.f32 %v463_v40, %v459_v37 }
 0x124   :  { %v174_v43 = vmul.f32 %v428_v39, %v165_v41 }
 0x125   :  { %v175_v44 = vmul.f32 %v428_v39, %v166_v42 }
 0x126   :  { %176 = vadd.xlane.f32.xlu0 %v174_v43 }
 0x12a   :  { %178 = vadd.xlane.f32.xlu0 %v175_v44 }
 0x1b3   :  { %v177_v46 = vpop.xlane.xlu0 %176 }
 0x1b4   :  { %v187_v49 = vrot.slane %v177_v46, %v593_v47 }
 0x1b7   :  { %v179_v48 = vpop.xlane.xlu0 %178 }
 0x1b8   :  { %v191_v50 = vrot.slane %v179_v48, %v593_v47 }
 0x1ba   :  { %v193_v51 = vsel %vm192_vm1, %v191_v50, %v187_v49 }
 0x1bb   :  { %v196_v52 = vsel %vm195_vm2, %v193_v51, -inf }
 0x1bc   :  { %197 = vmax.xlane.f32.xlu1 %v196_v52 }
 0x249   :  { %v198_v54 = vpop.xlane.xlu1 %197 }
 0x24a   :  { %v203_v55 = vrot.slane %v198_v54, %v586_v28  ;;  %v207_v56 = vrot.slane %v198_v54, %v579_v17 }
 0x24c   :  { %v210_v57 = vsub.f32 %v177_v46, %v203_v55  ;;  %v211_v58 = vsub.f32 %v179_v48, %v207_v56 }
 0x24e   :  { %v212_v59 = vmul.f32 1.442695, %v210_v57  ;;  %v214_v60 = vmul.f32 1.442695, %v211_v58 }
 0x250   :  { %464 = vpow2.f32 %v212_v59 }
 0x251   :  { %466 = vpow2.f32 %v214_v60 }
 0x25a   :  { %v465_v61 = vpop.eup %464 }
 0x25b   :  { %v467_v62 = vpop.eup %466  ;;  %219 = vperm.xlu1 %450, %v465_v61  }
 0x25c   :  { %222 = vperm.xlu0 %451, %v467_v62  }
 0x2da   :  { %v220_v63 = vpop.permute.xlu1 %219 }
 0x2db   :  { %v223_v0 = vpop.permute.xlu0 %222  ;;  %v227_v1 = vrot.slane %v220_v63, %v593_v47 }
 0x2dc   :  { %v231_v2 = vrot.slane %v223_v0, %v593_v47 }
 0x2de   :  { %v232_v3 = vsel %vm192_vm1, %v231_v2, %v227_v1 }
 0x2df   :  { %v234_v4 = vsel %vm195_vm2, %v232_v3, 0.0 }
 0x2e0   :  { %235 = vadd.xlane.f32.xlu1 %v234_v4 }
 0x36d   :  { %v236_v5 = vpop.xlane.xlu1 %235 }
 0x36e   :  { %468 = vrcp.f32 %v236_v5 }
 0x378   :  { %v469_v8 = vpop.eup %468 }
 0x379   :  { %v238_v9 = vmul.f32 %v469_v8, %v236_v5 }
 0x37b   :  { %v239_v11 = vsub.f32 2.0, %v238_v9 }
 0x37d   :  { %v240_v12 = vmul.f32 %v469_v8, %v239_v11 }
 0x37f   :  { %v245_v14 = vrot.slane %v240_v12, %v586_v28  ;;  %v249_v15 = vrot.slane %v240_v12, %v579_v17 }
 0x381   :  { %v253_v18 = vmul.f32 %v467_v62, %v249_v15  ;;  %v252_v19 = vmul.f32 %v465_v61, %v245_v14 }
 0x383   :  { %v263_v20 = vrot.slane %v252_v19, %v262_v13  ;;  %v256_v21 = vcombine.high %v252_v19, %v252_v19  ;;  %v273_v22 = vcombine.high %v253_v18, %v253_v18  ;;  %v280_v31 = vrot.slane %v253_v18, %v262_v13 }
 0x385   :  { %v296_v23 = vrot.slane %v263_v20, %v262_v13  ;;  %v270_v24 = vrot.slane %v256_v21, %v262_v13  ;;  %v271_v25 = vcombine.high %v263_v20, %v263_v20  ;;  %v287_v26 = vrot.slane %v273_v22, %v262_v13 }
 0x386   :  { %v324_v28 = vrot.slane %v280_v31, %v262_v13  ;;  %v288_v17 = vcombine.high %v280_v31, %v280_v31 }
 0x387   :  { %347 = vperm.xlu0 %451, %v296_v23   ;;  %v310_v27 = vrot.slane %v270_v24, %v262_v13  ;;  %v289_v29 = vcombine.high %v287_v26, %v287_v26  ;;  %v303_v30 = vrot.slane %v271_v25, %v262_v13  ;;  %v272_v33 = vcombine.high %v270_v24, %v270_v24 }
 0x388   :  { %v331_v32 = vrot.slane %v288_v17, %v262_v13  ;;  %v338_v35 = vrot.slane %v287_v26, %v262_v13 }
 0x389   :  { %353 = vperm.xlu1 %450, %v310_v27   ;;  %v345_v16 = vrot.slane %v289_v29, %v262_v13  ;;  %v317_v34 = vrot.slane %v272_v33, %v262_v13 }
 0x38b   :  { %350 = vperm.xlu0 %451, %v303_v30  }
 0x38d   :  { %368 = vperm.xlu1 %450, %v345_v16  }
 0x38f   :  { %359 = vperm.xlu0 %451, %v324_v28  }
 0x393   :  { %362 = vperm.xlu0 %451, %v331_v32  }
 0x397   :  { %356 = vperm.xlu0 %451, %v317_v34  }
 0x39b   :  { %365 = vperm.xlu0 %451, %v338_v35  }
 0x406   :  { %v348_v36 = vpop.permute.xlu0 %347 }
 0x407   :  { %v373_v41 = vrot.slane %v348_v36, %v593_v47 }
 0x408   :  { %v354_v42 = vpop.permute.xlu1 %353 }
 0x409   :  { %v381_v44 = vrot.slane %v354_v42, %v593_v47 }
 0x40a   :  { %v351_v37 = vpop.permute.xlu0 %350 }
 0x40b   :  { %v377_v39 = vrot.slane %v351_v37, %v593_v47 }
 0x40c   :  { %v369_v50 = vpop.permute.xlu1 %368 }
 0x40d   :  { %v402_v43 = vsel %vm192_vm1, %v377_v39, %v373_v41  ;;  %v401_v57 = vrot.slane %v369_v50, %v593_v47 }
 0x40e   :  { %v360_v38 = vpop.permute.xlu0 %359  ;;  %v404_v49 = vsel %vm403_vm3, %v381_v44, %v402_v43 }
 0x40f   :  { %v389_v48 = vrot.slane %v360_v38, %v593_v47 }
 0x412   :  { %v363_v40 = vpop.permute.xlu0 %362 }
 0x413   :  { %v393_v51 = vrot.slane %v363_v40, %v593_v47 }
 0x416   :  { %v357_v45 = vpop.permute.xlu0 %356 }
 0x417   :  { %v385_v46 = vrot.slane %v357_v45, %v593_v47 }
 0x419   :  { %v406_v52 = vsel %vm405_vm4, %v385_v46, %v404_v49 }
 0x41a   :  { %v408_v53 = vsel %vm407_vm5, %v389_v48, %v406_v52  ;;  %v366_v54 = vpop.permute.xlu0 %365 }
 0x41b   :  { %v410_v55 = vsel %vm409_vm6, %v393_v51, %v408_v53  ;;  %v397_v56 = vrot.slane %v366_v54, %v593_v47 }
 0x41d   :  { %v412_v58 = vsel %vm411_vm7, %v397_v56, %v410_v55 }
 0x41e   :  { %v414_v59 = vsel %vm413_vm8, %v401_v57, %v412_v58 }
 0x41f   :  { %417 = vst.msk [vmem:[%s624_s4] sm:$0xff] %vm416_vm9, %v414_v59 }
 0x420   :  { %422 = vsyncpa [#allocation3], 1 }
 0x421   :  { %423 = vsyncpa [#allocation5], 1 }

</bundles_post_ra>
